<compile_context>
chip_gen: v6e
topology: v6e:2x2x1
jax: 0.10.0
libtpu: 0.0.40
codegen_flags: <defaults>
</compile_context>

<pallas_src>
import functools

import jax
import jax.numpy as jnp
from jax import lax
from jax.experimental import pallas as pl
from jax.experimental.pallas import tpu as pltpu


def _softplus(x):
    # Stable softplus: log(1 + exp(x)) = max(x, 0) + log(1 + exp(-|x|)).
    # exp(-|x|) <= 1, so the log argument is in [1, 2]: no overflow, same EUP
    # op count (one exp + one log) as the literal PyTorch formula.
    return jnp.maximum(x, 0.0) + jnp.log(1.0 + jnp.exp(-jnp.abs(x)))


def _pnn_loss_kernel(mean_ref, logvar_ref, target_ref, maxlv_ref, minlv_ref,
                     o_ref, *, lambda_mean, lambda_cov, batch, lane_tile):
    i = pl.program_id(0)

    mean = mean_ref[...].astype(jnp.float32)       # (d, tb)  batch on lanes
    logvar = logvar_ref[...].astype(jnp.float32)   # (d, tb)
    target = target_ref[...].astype(jnp.float32)   # (d, tb)
    max_lv = maxlv_ref[...]                        # (d, 1) -> lane broadcast
    min_lv = minlv_ref[...]                        # (d, 1)

    # Bound logvar between min_logvar and max_logvar via the softplus trick.
    lv = max_lv - _softplus(max_lv - logvar)
    lv = min_lv + _softplus(lv - min_lv)

    # inv_var = exp(-lv) replaces exp(lv) followed by a divide (saves one EUP
    # push per element).
    inv_var = jnp.exp(-lv)

    diff = mean - target
    a_term = lambda_mean * jnp.sum(diff * diff * inv_var, axis=0, keepdims=True)
    # log|prod_j var_j| == sum_j lv_j because var = exp(lv) > 0.
    b_term = lambda_cov * jnp.sum(lv, axis=0, keepdims=True)
    per_example = a_term + b_term                  # (1, tb), lane-dense

    # Zero the padded lanes of a partial boundary tile with a select (NOT a
    # multiply): padded lanes can be inf/nan after exp of uninitialized VMEM.
    col = lax.broadcasted_iota(jnp.int32, per_example.shape, 1)
    valid = (i * lane_tile + col) < batch
    o_ref[...] = jnp.where(valid, per_example, 0.0).astype(o_ref.dtype)


def _round_up(x, m):
    return ((x + m - 1) // m) * m


def pnn_gaussian_loss(output, target, max_logvar, min_logvar, *,
                      lambda_mean=1.0, lambda_cov=1.0, lane_tile=None):
    """Pallas-backed equivalent of PNNLoss_Gaussian.forward.

    output:     [B, 2d]  (first d columns = mean, last d columns = logvar)
    target:     [B, d]
    max_logvar: [d] or [1, d]
    min_logvar: [d] or [1, d]
    Returns a scalar f32 loss.
    """
    B, d2 = output.shape
    d = d2 // 2
    assert d2 == 2 * d, "output width must be even (mean | logvar)"
    assert target.shape == (B, d), f"target must be (B, d), got {target.shape}"

    # Feature-major (lane-dense) layout.  Each slice+transpose is a single
    # fused XLA copy; dtype stays native (the kernel upcasts per tile in VMEM).
    mean_t = output[:, :d].T        # (d, B)
    logvar_t = output[:, d:].T      # (d, B)
    target_t = target.T             # (d, B)
    max_lv = jnp.asarray(max_logvar, jnp.float32).reshape(d, 1)
    min_lv = jnp.asarray(min_logvar, jnp.float32).reshape(d, 1)

    itemsize = jnp.dtype(output.dtype).itemsize
    padded_b = _round_up(B, 128)

    if lane_tile is None:
        # ~1 MiB of HBM traffic per streaming input block.
        tb = (1 << 20) // max(d * itemsize, 1)
        tb = max(128, (tb // 128) * 128)
    else:
        tb = _round_up(max(int(lane_tile), 1), 128)
    # Guarantee >= 2 grid steps when the batch allows it (megacore split on
    # v7x, DMA/compute overlap everywhere).
    if padded_b >= 256:
        tb = min(tb, _round_up(pl.cdiv(padded_b, 2), 128))
    tb = min(tb, padded_b)

    n_tiles = pl.cdiv(B, tb)
    grid = (n_tiles,)

    # Explicit VMEM budget: 3 double-buffered streaming inputs + output blocks
    # + generous headroom for in-kernel f32 temporaries.  Capped at 48 MiB so
    # it stays inside v7x's 64 MiB physical VMEM.
    padded_d = _round_up(d, 8)
    blk_in = padded_d * tb * itemsize
    blk_f32 = padded_d * tb * 4
    vmem_need = 2 * (3 * blk_in + tb * 4) + 6 * blk_f32 + (1 << 20)
    vmem_limit = int(min(max(vmem_need, 16 << 20), 48 << 20))

    row_spec = pl.BlockSpec((d, tb), lambda i: (0, i))
    bound_spec = pl.BlockSpec((d, 1), lambda i: (0, 0))

    kernel = functools.partial(_pnn_loss_kernel,
                               lambda_mean=float(lambda_mean),
                               lambda_cov=float(lambda_cov),
                               batch=B, lane_tile=tb)

    cost = pl.CostEstimate(
        flops=12 * B * d,
        transcendentals=5 * B * d,                 # 2x(exp+log) + exp(-lv)
        bytes_accessed=int(itemsize * 3 * B * d + 4 * (2 * d + n_tiles * tb)),
    )

    per_example = pl.pallas_call(
        kernel,
        out_shape=jax.ShapeDtypeStruct((1, n_tiles * tb), jnp.float32),
        grid_spec=pltpu.PrefetchScalarGridSpec(
            num_scalar_prefetch=0,
            grid=grid,
            in_specs=[row_spec, row_spec, row_spec, bound_spec, bound_spec],
            out_specs=pl.BlockSpec((1, tb), lambda i: (0, i)),
        ),
        compiler_params=pltpu.CompilerParams(
            dimension_semantics=("parallel",),
            vmem_limit_bytes=vmem_limit),
        cost_estimate=cost,
    )(mean_t, logvar_t, target_t, max_lv, min_lv)

    # Final reduction of B (padded) lane-dense values is a trivial XLA reduce;
    # keeps the Pallas grid fully parallel.
    return jnp.sum(per_example)


def reference_loss(output, target, max_logvar, min_logvar,
                   lambda_mean=1.0, lambda_cov=1.0):
    """Pure-JAX transcription of PNNLoss_Gaussian.forward (PyTorch formulas)."""
    output = output.astype(jnp.float32)
    target = target.astype(jnp.float32)
    d = output.shape[1] // 2
    mean = output[:, :d]
    logvar = output[:, d:]
    max_lv = jnp.asarray(max_logvar, jnp.float32).reshape(1, d)
    min_lv = jnp.asarray(min_logvar, jnp.float32).reshape(1, d)
    logvar = max_lv - jnp.log(1.0 + jnp.exp(max_lv - logvar))
    logvar = min_lv + jnp.log(1.0 + jnp.exp(logvar - min_lv))
    var = jnp.exp(logvar)
    a = lambda_mean * jnp.sum((mean - target) ** 2 / var, axis=1)
    b = lambda_cov * jnp.log(jnp.abs(jnp.prod(var, axis=1)))
    return jnp.sum(a + b)


if __name__ == "__main__":
    d = 9                       # matches the module's default idx of 9 states
    key = jax.random.PRNGKey(0)
    k1, k2, k3, k4 = jax.random.split(key, 4)
    max_logvar = jnp.full((1, d), 0.5, dtype=jnp.float32)
    min_logvar = jnp.full((1, d), -4.0, dtype=jnp.float32)

    # Case 1: small batch (single partial lane tile).
    out_small = jax.random.normal(k1, (30, 2 * d), dtype=jnp.float32)
    tgt_small = jax.random.normal(k2, (30, d), dtype=jnp.float32)
    loss_small = jax.block_until_ready(
        pnn_gaussian_loss(out_small, tgt_small, max_logvar, min_logvar))
    ref_small = reference_loss(out_small, tgt_small, max_logvar, min_logvar)
    assert loss_small.shape == ()
    assert jnp.allclose(loss_small, ref_small, rtol=1e-3, atol=1e-2), (
        loss_small, ref_small)

    # Case 2: larger batch -> multi-step grid with a partial boundary tile
    # (exercises the in-kernel lane mask), default and forced-small tiles.
    out_big = jax.random.normal(k3, (300, 2 * d), dtype=jnp.float32)
    tgt_big = jax.random.normal(k4, (300, d), dtype=jnp.float32)
    ref_big = reference_loss(out_big, tgt_big, max_logvar, min_logvar)
    loss_big = jax.block_until_ready(
        pnn_gaussian_loss(out_big, tgt_big, max_logvar, min_logvar))
    loss_tiled = jax.block_until_ready(
        pnn_gaussian_loss(out_big, tgt_big, max_logvar, min_logvar,
                          lane_tile=128))
    assert jnp.allclose(loss_big, ref_big, rtol=1e-3, atol=1e-2), (
        loss_big, ref_big)
    assert jnp.allclose(loss_tiled, ref_big, rtol=1e-3, atol=1e-2), (
        loss_tiled, ref_big)

    # Case 3: native bf16 streaming path (no wrapper upcast); both kernel and
    # reference upcast the same bf16 values to f32, so they should agree.
    out_bf = out_big.astype(jnp.bfloat16)
    tgt_bf = tgt_big.astype(jnp.bfloat16)
    ref_bf = reference_loss(out_bf, tgt_bf, max_logvar, min_logvar)
    loss_bf = jax.block_until_ready(
        pnn_gaussian_loss(out_bf, tgt_bf, max_logvar, min_logvar))
    assert jnp.allclose(loss_bf, ref_bf, rtol=2e-3, atol=5e-2), (loss_bf, ref_bf)

    print("KERNEL_OK")
</pallas_src>

<mosaic_0001>
module attributes {stable_mosaic.version = 11 : i64} {
  func.func @_pnn_loss_kernel(%arg0: i32, %arg1: memref<9x128xf32, #tpu.memory_space<vmem>>, %arg2: memref<9x128xf32, #tpu.memory_space<vmem>>, %arg3: memref<9x128xf32, #tpu.memory_space<vmem>>, %arg4: memref<9x1xf32, #tpu.memory_space<vmem>>, %arg5: memref<9x1xf32, #tpu.memory_space<vmem>>, %arg6: memref<1x128xf32, #tpu.memory_space<vmem>>) attributes {dimension_semantics = [#tpu.dimension_semantics<parallel>], iteration_bounds = array<i64: 1>, scalar_prefetch = 0 : i64, scratch_operands = 0 : i64, tpu.core_type = #tpu.core_type<tc>, window_params = [{transform_indices = @transform_0, window_bounds = array<i64: 9, 128>}, {transform_indices = @transform_1, window_bounds = array<i64: 9, 128>}, {transform_indices = @transform_2, window_bounds = array<i64: 9, 128>}, {pipeline_mode = #tpu.pipeline_mode<synchronous>, transform_indices = @transform_3, window_bounds = array<i64: 9, 1>}, {pipeline_mode = #tpu.pipeline_mode<synchronous>, transform_indices = @transform_4, window_bounds = array<i64: 9, 1>}, {transform_indices = @transform_5, window_bounds = array<i64: 1, 128>}]} {
    %c0 = arith.constant 0 : index
    %c0_0 = arith.constant 0 : index
    %0 = vector.load %arg1[%c0, %c0_0] : memref<9x128xf32, #tpu.memory_space<vmem>>, vector<9x128xf32>
    %c0_1 = arith.constant 0 : index
    %c0_2 = arith.constant 0 : index
    %1 = vector.load %arg2[%c0_1, %c0_2] : memref<9x128xf32, #tpu.memory_space<vmem>>, vector<9x128xf32>
    %c0_3 = arith.constant 0 : index
    %c0_4 = arith.constant 0 : index
    %2 = vector.load %arg3[%c0_3, %c0_4] : memref<9x128xf32, #tpu.memory_space<vmem>>, vector<9x128xf32>
    %c0_5 = arith.constant 0 : index
    %c0_6 = arith.constant 0 : index
    %3 = vector.load %arg4[%c0_5, %c0_6] : memref<9x1xf32, #tpu.memory_space<vmem>>, vector<9x1xf32>
    %c0_7 = arith.constant 0 : index
    %c0_8 = arith.constant 0 : index
    %4 = vector.load %arg5[%c0_7, %c0_8] : memref<9x1xf32, #tpu.memory_space<vmem>>, vector<9x1xf32>
    %5 = vector.broadcast %3 : vector<9x1xf32> to vector<9x128xf32>
    %6 = arith.subf %5, %1 : vector<9x128xf32>
    %cst = arith.constant 0.000000e+00 : f32
    %7 = vector.broadcast %cst : f32 to vector<9x128xf32>
    %8 = arith.maximumf %6, %7 : vector<9x128xf32>
    %9 = math.absf %6 : vector<9x128xf32>
    %cst_9 = arith.constant 0.000000e+00 : f32
    %10 = vector.broadcast %cst_9 : f32 to vector<9x128xf32>
    %11 = arith.subf %10, %9 : vector<9x128xf32>
    %12 = math.exp %11 : vector<9x128xf32>
    %cst_10 = arith.constant 1.000000e+00 : f32
    %13 = vector.broadcast %cst_10 : f32 to vector<9x128xf32>
    %14 = arith.addf %13, %12 : vector<9x128xf32>
    %15 = math.log %14 : vector<9x128xf32>
    %16 = arith.addf %8, %15 : vector<9x128xf32>
    %17 = vector.broadcast %3 : vector<9x1xf32> to vector<9x128xf32>
    %18 = arith.subf %17, %16 : vector<9x128xf32>
    %19 = vector.broadcast %4 : vector<9x1xf32> to vector<9x128xf32>
    %20 = arith.subf %18, %19 : vector<9x128xf32>
    %cst_11 = arith.constant 0.000000e+00 : f32
    %21 = vector.broadcast %cst_11 : f32 to vector<9x128xf32>
    %22 = arith.maximumf %20, %21 : vector<9x128xf32>
    %23 = math.absf %20 : vector<9x128xf32>
    %cst_12 = arith.constant 0.000000e+00 : f32
    %24 = vector.broadcast %cst_12 : f32 to vector<9x128xf32>
    %25 = arith.subf %24, %23 : vector<9x128xf32>
    %26 = math.exp %25 : vector<9x128xf32>
    %cst_13 = arith.constant 1.000000e+00 : f32
    %27 = vector.broadcast %cst_13 : f32 to vector<9x128xf32>
    %28 = arith.addf %27, %26 : vector<9x128xf32>
    %29 = math.log %28 : vector<9x128xf32>
    %30 = arith.addf %22, %29 : vector<9x128xf32>
    %31 = vector.broadcast %4 : vector<9x1xf32> to vector<9x128xf32>
    %32 = arith.addf %31, %30 : vector<9x128xf32>
    %cst_14 = arith.constant 0.000000e+00 : f32
    %33 = vector.broadcast %cst_14 : f32 to vector<9x128xf32>
    %34 = arith.subf %33, %32 : vector<9x128xf32>
    %35 = math.exp %34 : vector<9x128xf32>
    %36 = arith.subf %0, %2 : vector<9x128xf32>
    %37 = arith.mulf %36, %36 : vector<9x128xf32>
    %38 = arith.mulf %37, %35 : vector<9x128xf32>
    %cst_15 = arith.constant dense<0.000000e+00> : vector<128xf32>
    %39 = vector.multi_reduction <add>, %38, %cst_15 [0] : vector<9x128xf32> to vector<128xf32>
    %40 = vector.shape_cast %39 : vector<128xf32> to vector<1x128xf32>
    %cst_16 = arith.constant 1.000000e+00 : f32
    %41 = vector.broadcast %cst_16 : f32 to vector<1x128xf32>
    %42 = arith.mulf %41, %40 : vector<1x128xf32>
    %cst_17 = arith.constant dense<0.000000e+00> : vector<128xf32>
    %43 = vector.multi_reduction <add>, %32, %cst_17 [0] : vector<9x128xf32> to vector<128xf32>
    %44 = vector.shape_cast %43 : vector<128xf32> to vector<1x128xf32>
    %cst_18 = arith.constant 1.000000e+00 : f32
    %45 = vector.broadcast %cst_18 : f32 to vector<1x128xf32>
    %46 = arith.mulf %45, %44 : vector<1x128xf32>
    %47 = arith.addf %42, %46 : vector<1x128xf32>
    %48 = tpu.iota {dimensions = array<i32: 1>} : vector<1x128xi32>
    %c128_i32 = arith.constant 128 : i32
    %49 = arith.muli %arg0, %c128_i32 : i32
    %50 = vector.broadcast %49 : i32 to vector<1x128xi32>
    %51 = arith.addi %50, %48 : vector<1x128xi32>
    %c30_i32 = arith.constant 30 : i32
    %52 = vector.broadcast %c30_i32 : i32 to vector<1x128xi32>
    %53 = arith.cmpi slt, %51, %52 : vector<1x128xi32>
    %cst_19 = arith.constant 0.000000e+00 : f32
    %54 = vector.broadcast %cst_19 : f32 to vector<1x128xf32>
    %55 = arith.select %53, %47, %54 : vector<1x128xi1>, vector<1x128xf32>
    %c0_20 = arith.constant 0 : index
    %c0_21 = arith.constant 0 : index
    %56 = vector.load %arg6[%c0_20, %c0_21] : memref<1x128xf32, #tpu.memory_space<vmem>>, vector<1x128xf32>
    tpu.vector_store %arg6[%c0_20, %c0_21], %55 {strides = array<i32>} : memref<1x128xf32, #tpu.memory_space<vmem>>, vector<1x128xf32>,
    return
  }
  func.func @transform_0(%arg0: i32) -> (i32, i32) {
    %c0_i32 = arith.constant 0 : i32
    %c0_i32_0 = arith.constant 0 : i32
    return %c0_i32, %arg0 : i32, i32
  }
  func.func @transform_1(%arg0: i32) -> (i32, i32) {
    %c0_i32 = arith.constant 0 : i32
    %c0_i32_0 = arith.constant 0 : i32
    return %c0_i32, %arg0 : i32, i32
  }
  func.func @transform_2(%arg0: i32) -> (i32, i32) {
    %c0_i32 = arith.constant 0 : i32
    %c0_i32_0 = arith.constant 0 : i32
    return %c0_i32, %arg0 : i32, i32
  }
  func.func @transform_3(%arg0: i32) -> (i32, i32) {
    %c0_i32 = arith.constant 0 : i32
    %c0_i32_0 = arith.constant 0 : i32
    %c0_i32_1 = arith.constant 0 : i32
    return %c0_i32, %c0_i32_0 : i32, i32
  }
  func.func @transform_4(%arg0: i32) -> (i32, i32) {
    %c0_i32 = arith.constant 0 : i32
    %c0_i32_0 = arith.constant 0 : i32
    %c0_i32_1 = arith.constant 0 : i32
    return %c0_i32, %c0_i32_0 : i32, i32
  }
  func.func @transform_5(%arg0: i32) -> (i32, i32) {
    %c0_i32 = arith.constant 0 : i32
    %c0_i32_0 = arith.constant 0 : i32
    return %c0_i32, %arg0 : i32, i32
  }
}

</mosaic_0001>

<bundles_post_ra>
// kernel: tpu_custom_call.1
= control target key start
LH: loop header
LB: loop body
LE: loop exit
PB: predicated region body
PF: predicated region fallthrough
CT: control target
= control target key end

     0   :  { %10 = vsyncpa [#allocation3], 0  ;;  %s300_s0 = inlined_call_operand.vmem [shape: f32[9,30], index: 0, kind: input, shape index: {}]   ;;  %s301_s1 = inlined_call_operand.vmem [shape: f32[9,30], index: 1, kind: input, shape index: {}]   ;;  %s302_s2 = inlined_call_operand.hbm [shape: f32[9,30], index: 2, kind: input, shape index: {}]   ;;  %s303_s3 = inlined_call_operand.vmem [shape: f32[9,1], index: 3, kind: input, shape index: {}]   ;;  %s304_s4 = inlined_call_operand.vmem [shape: f32[9,1], index: 4, kind: input, shape index: {}]   ;;  %s305_s5 = inlined_call_operand.hbm [shape: f32[1,128], index: 5, kind: output, shape index: {}]  }
   0x1   :  { %11 = vsyncpa [#allocation4], 0  ;;  %s233_s18 = smov [#allocation2]  }
   0x2   :  { %s21_s19 = sshll.u32 %s233_s18, 4  ;;  %s22_s19 = int_to_ptr.vmem [resolvable:$true] %s21_s19 }
   0x3   :  { %s197_s20 = scalar_lea.vmem %s22_s19, 256  ;;  %p202_p1 = scmp.lt.s32.totalorder %s22_s19, %s22_s19 }
   0x4   :  { %p198_p0 = scmp.ne.s32.totalorder %s22_s19, %s197_s20  ;;  %p203_p2 = scmp.lt.s32.totalorder %s197_s20, %s197_s20 }
   0x6   :  { %p204_p3 = por %p203_p2, %p202_p1 }
   0x8   :  { %p205_p4 = pnand %p204_p3, %p198_p0 }
   0xa   :  { %208 = shalt.err (!%p205_p4)
}
   0xb   :  { %s234_s21 = smov 128   ;;  %s235_s22 = smov 8  }
   0xc   :  { %27 = dma.hbm_to_vmem [thread:$0]  %s302_s2, 256, %s22_s19, [#allocation3], %s234_s21, %s234_s21, %s235_s22  }
   0xd   :  { %229 = dma.done.wait [#allocation3], 256  }
   0xe   :  { %230 = vsyncadd [#allocation3], 4294967040  ;;  %v236_v0 = vmov 0   ;;  %v42_v1 = vld [vmem:[%s303_s3 + $0x8] sm:$0x1]  ;;  %v41_v3 = vld [vmem:[%s303_s3] sm:$0xff] }
   0xf   :  { %167 = vset.pattern.permute.xlu0 %v236_v0  ;;  %168 = vset.pattern.permute.xlu1 %v236_v0  ;;  %v44_v2 = vld [vmem:[%s304_s4 + $0x8] sm:$0x1]  ;;  %v43_v4 = vld [vmem:[%s304_s4] sm:$0xff]  ;;  %vm121_vm0 = vcmask 1040384  }
  0x10   :  { %52 = vperm.xlu0 %167, %v42_v1   ;;  %84 = vperm.xlu1 %168, %v44_v2   ;;  %v38_v5 = vld [vmem:[%s301_s1 + $0x8] sm:$0x1]  ;;  %v37_v8 = vld [vmem:[%s301_s1] sm:$0xff] }
  0x11   :  { %v36_v59 = vld [vmem:[%s300_s0 + $0x8] sm:$0x1]  ;;  %v35_v61 = vld [vmem:[%s300_s0] sm:$0xff]  ;;  %s237_s0 = smov [#allocation5]  }
  0x12   :  { %v40_v60 = vld [vmem:[#allocation2 + $0x8] sm:$0x1]  ;;  %v39_v62 = vld [vmem:[#allocation2] sm:$0xff]  ;;  %s153_s12 = sshll.u32 %s237_s0, 4  ;;  %s154_s12 = int_to_ptr.vmem [resolvable:$true] %s153_s12 }
  0x13   :  { %v116_v63 = vsub.f32 %v36_v59, %v40_v60  ;;  %v115_v2 = vsub.f32 %v35_v61, %v39_v62  ;;  %s209_s13 = scalar_lea.vmem %s154_s12, 16  ;;  %s213_s14 = scalar_lea.vmem %s154_s12, 32 }
  0x14   :  { %47 = vperm.xlu0 %167, %v41_v3   ;;  %79 = vperm.xlu1 %168, %v43_v4   ;;  %p210_p5 = scmp.ne.s32.totalorder %s154_s12, %s209_s13  ;;  %p214_p6 = scmp.lt.s32.totalorder %s154_s12, %s154_s12 }
  0x15   :  { %v118_v3 = vmul.f32 %v116_v63, %v116_v63  ;;  %p215_p7 = scmp.lt.s32.totalorder %s213_s14, %s209_s13 }
  0x17   :  { %p216_p8 = por %p215_p7, %p214_p6 }
  0x19   :  { %p217_p9 = pnand %p216_p8, %p210_p5 }
  0x8b   :  { %v53_v6 = vpop.permute.xlu0 %52  ;;  %v85_v26 = vpop.permute.xlu1 %84 }
  0x8c   :  { %v56_v7 = vsub.f32 %v53_v6, %v38_v5 }
  0x8e   :  { %v60_v9 = vand.u32 2147483647, %v56_v7  ;;  %v58_v22 = vmax.f32 %v56_v7, 0.0 }
  0x8f   :  { %v48_v10 = vpop.permute.xlu0 %47  ;;  %v80_v34 = vpop.permute.xlu1 %79 }
  0x90   :  { %v62_v11 = vsub.f32 0.0, %v60_v9  ;;  %v55_v12 = vsub.f32 %v48_v10, %v37_v8 }
  0x92   :  { %v65_v13 = vmul.f32 1.442695, %v62_v11  ;;  %v59_v14 = vand.u32 2147483647, %v55_v12  ;;  %v57_v28 = vmax.f32 %v55_v12, 0.0 }
  0x94   :  { %169 = vpow2.f32 %v65_v13  ;;  %v61_v15 = vsub.f32 0.0, %v59_v14 }
  0x96   :  { %v63_v16 = vmul.f32 1.442695, %v61_v15 }
  0x98   :  { %171 = vpow2.f32 %v63_v16 }
  0xa1   :  { %v170_v17 = vpop.eup %169 }
  0xa2   :  { %v68_v18 = vadd.f32 1.0, %v170_v17  ;;  %v139_v17 = vlaneseq }
  0xa4   :  { %173 = vlog2.f32 %v68_v18 }
  0xa5   :  { %v172_v19 = vpop.eup %171 }
  0xa6   :  { %v67_v20 = vadd.f32 1.0, %v172_v19 }
  0xa8   :  { %175 = vlog2.f32 %v67_v20 }
  0xb1   :  { %v174_v21 = vpop.eup %173 }
  0xb2   :  { %v72_v23 = vmul.f32 0.6931472, %v174_v21  ;;  %v140_v21 = vand.u32 127, %v139_v17 }
  0xb4   :  { %v74_v24 = vadd.f32 %v72_v23, %v58_v22  ;;  %vm144_vm1 = vcmp.lt.s32.totalorder %v140_v21, 30 }
  0xb5   :  { %v176_v25 = vpop.eup %175 }
  0xb6   :  { %v76_v27 = vsub.f32 %v53_v6, %v74_v24  ;;  %v70_v29 = vmul.f32 0.6931472, %v176_v25  ;;  %v117_v6 = vmul.f32 %v115_v2, %v115_v2 }
  0xb8   :  { %v73_v30 = vadd.f32 %v70_v29, %v57_v28  ;;  %v88_v31 = vsub.f32 %v76_v27, %v85_v26 }
  0xba   :  { %v75_v32 = vsub.f32 %v48_v10, %v73_v30  ;;  %v92_v33 = vand.u32 2147483647, %v88_v31  ;;  %v90_v46 = vmax.f32 %v88_v31, 0.0 }
  0xbc   :  { %v94_v35 = vsub.f32 0.0, %v92_v33  ;;  %v87_v36 = vsub.f32 %v75_v32, %v80_v34 }
  0xbe   :  { %v97_v37 = vmul.f32 1.442695, %v94_v35  ;;  %v91_v38 = vand.u32 2147483647, %v87_v36  ;;  %v89_v51 = vmax.f32 %v87_v36, 0.0 }
  0xc0   :  { %177 = vpow2.f32 %v97_v37  ;;  %v93_v39 = vsub.f32 0.0, %v91_v38 }
  0xc2   :  { %v95_v40 = vmul.f32 1.442695, %v93_v39 }
  0xc4   :  { %179 = vpow2.f32 %v95_v40 }
  0xcd   :  { %v178_v41 = vpop.eup %177 }
  0xce   :  { %v100_v42 = vadd.f32 1.0, %v178_v41 }
  0xd0   :  { %181 = vlog2.f32 %v100_v42 }
  0xd1   :  { %v180_v43 = vpop.eup %179 }
  0xd2   :  { %v99_v44 = vadd.f32 1.0, %v180_v43 }
  0xd4   :  { %183 = vlog2.f32 %v99_v44 }
  0xdd   :  { %v182_v45 = vpop.eup %181 }
  0xde   :  { %v104_v47 = vmul.f32 0.6931472, %v182_v45 }
  0xe0   :  { %v106_v48 = vadd.f32 %v104_v47, %v90_v46 }
  0xe1   :  { %v184_v49 = vpop.eup %183 }
  0xe2   :  { %v108_v50 = vadd.f32 %v106_v48, %v85_v26  ;;  %v102_v52 = vmul.f32 0.6931472, %v184_v49 }
  0xe4   :  { %v110_v53 = vsub.f32 0.0, %v108_v50  ;;  %v105_v54 = vadd.f32 %v102_v52, %v89_v51  ;;  %v130_v0 = vsel %vm121_vm0, %v108_v50, 0.0 }
  0xe6   :  { %v113_v55 = vmul.f32 1.442695, %v110_v53  ;;  %v107_v56 = vadd.f32 %v105_v54, %v80_v34 }
  0xe8   :  { %185 = vpow2.f32 %v113_v55  ;;  %v109_v57 = vsub.f32 0.0, %v107_v56  ;;  %v131_v1 = vadd.f32 %v130_v0, %v107_v56 }
  0xea   :  { %v111_v58 = vmul.f32 1.442695, %v109_v57  ;;  %v132_v4 = vrot.slane %v131_v1, 4 }
  0xec   :  { %187 = vpow2.f32 %v111_v58  ;;  %v133_v8 = vadd.f32 %v132_v4, %v131_v1 }
  0xee   :  { %v134_v13 = vrot.slane %v133_v8, 2 }
  0xf0   :  { %v135_v16 = vadd.f32 %v134_v13, %v133_v8 }
  0xf2   :  { %v136_v19 = vrot.slane %v135_v16, 1 }
  0xf4   :  { %v137_v24 = vadd.f32 %v136_v19, %v135_v16 }
  0xf5   :  { %v186_v5 = vpop.eup %185 }
  0xf6   :  { %v120_v7 = vmul.f32 %v186_v5, %v118_v3 }
  0xf8   :  { %v122_v11 = vsel %vm121_vm0, %v120_v7, 0.0 }
  0xf9   :  { %v188_v9 = vpop.eup %187 }
  0xfa   :  { %v119_v10 = vmul.f32 %v188_v9, %v117_v6 }
  0xfc   :  { %v123_v12 = vadd.f32 %v122_v11, %v119_v10 }
  0xfe   :  { %v124_v14 = vrot.slane %v123_v12, 4 }
 0x100   :  { %v125_v15 = vadd.f32 %v124_v14, %v123_v12 }
 0x102   :  { %v126_v18 = vrot.slane %v125_v15, 2 }
 0x104   :  { %v127_v20 = vadd.f32 %v126_v18, %v125_v15 }
 0x106   :  { %v128_v22 = vrot.slane %v127_v20, 1 }
 0x108   :  { %v129_v23 = vadd.f32 %v128_v22, %v127_v20 }
 0x10a   :  { %v138_v25 = vadd.f32 %v137_v24, %v129_v23 }
 0x10c   :  { %v145_v26 = vsel %vm144_vm1, %v138_v25, 0.0 }
 0x10d   :  { %146 = vst [vmem:[#allocation5] sm:$0x1] %v145_v26 }
 0x10e   :  { %220 = shalt.err (!%p217_p9)
}
 0x10f   :  { %156 = dma.vmem_to_hbm [thread:$0]  %s154_s12, 16, %s305_s5, [#allocation4]  }
 0x110   :  { %231 = dma.done.wait [#allocation4], 16  }
 0x111   :  { %232 = vsyncadd [#allocation4], 4294967280 }
 0x112   :  { %160 = vsyncpa [#allocation3], 1 }
 0x113   :  { %161 = vsyncpa [#allocation4], 1 }

</bundles_post_ra>
